<compile_context>
chip_gen: v6e
topology: v6e:2x2x1
jax: 0.10.0
libtpu: 0.0.40
codegen_flags: <defaults>
</compile_context>

<pallas_src>
import jax
import jax.numpy as jnp
from jax.experimental import pallas as pl
from jax.experimental.pallas import tpu as pltpu

HIDDEN_STATE_DIM = 768
NUM_CLASSES = 2

LANES = 128       # TPU lane width: pad the class dim so stores are lane-dense.
SUBLANES = 8      # f32 sublane count: pad/tile the batch dim to multiples of 8.
NEG_INF = -1e30   # bias mask for padded class lanes (exp underflows to 0).


def _round_up(x, m):
    return ((x + m - 1) // m) * m


# ----------------------------------------------------------------------------
# Pallas kernel: linear head + log_softmax on one batch tile of CLS vectors.
# ----------------------------------------------------------------------------
def clf_head_kernel(cls_ref, w_ref, b_ref, out_ref):
    # cls_ref: [TB, H]      bf16  (CLS hidden states for this batch tile)
    # w_ref  : [H, LANES]   bf16  (real weight in first C lanes, zeros after)
    # b_ref  : [1, LANES]   f32   (real bias in first C lanes, NEG_INF after)
    # out_ref: [TB, LANES]  f32   (log-probs; padded lanes hold ~NEG_INF)
    # TODO(synk): nn.Dropout(p=0.2) is identity at inference; training-mode
    # dropout (pltpu.prng_random_bits mask) not emitted here.
    scores = jnp.dot(cls_ref[...], w_ref[...],
                     preferred_element_type=jnp.float32) + b_ref[...]  # [TB,128]

    # Numerically-stable log_softmax over class lanes. Padded lanes carry a
    # NEG_INF bias, so exp() underflows to 0 and they drop out of the sum;
    # the max is taken over real (finite) scores.
    m = jnp.max(scores, axis=1, keepdims=True)                  # [TB, 1]
    z = scores - m
    lse = jnp.log(jnp.sum(jnp.exp(z), axis=1, keepdims=True))   # [TB, 1]
    out_ref[...] = z - lse


def fact_verification_head(all_hidden_states, weight, bias, *, batch_tile=256):
    """all_hidden_states: [B, S, H] f32; weight: [H, C] f32; bias: [C] f32."""
    B, S, H = all_hidden_states.shape
    C = weight.shape[1]
    assert H % LANES == 0, "hidden dim must be a multiple of 128"

    # CLS selection in the wrapper: only [B, H] (not [B, S, H]) crosses the
    # HBM->VMEM boundary.  bf16 cast halves DMA bytes and takes the native
    # MXU path; accumulation stays f32 inside the kernel.
    cls = all_hidden_states[:, 0, :].astype(jnp.bfloat16)        # [B, H]

    # Sublane-aligned batch tile; pad B up so every grid step is a full tile.
    TB = min(batch_tile, _round_up(B, SUBLANES))
    Bp = _round_up(B, TB)
    if Bp != B:
        cls = jnp.pad(cls, ((0, Bp - B), (0, 0)))

    # Lane-dense weight/bias: pad class dim to 128 lanes.
    w_p = jnp.zeros((H, LANES), jnp.bfloat16).at[:, :C].set(
        weight.astype(jnp.bfloat16))
    b_p = jnp.full((1, LANES), NEG_INF, jnp.float32).at[:, :C].set(
        bias.astype(jnp.float32))

    out = pl.pallas_call(
        clf_head_kernel,
        out_shape=jax.ShapeDtypeStruct((Bp, LANES), jnp.float32),
        grid=(Bp // TB,),
        in_specs=[
            pl.BlockSpec((TB, H), lambda i: (i, 0)),      # per-tile CLS rows
            pl.BlockSpec((H, LANES), lambda i: (0, 0)),   # weight (resident)
            pl.BlockSpec((1, LANES), lambda i: (0, 0)),   # bias   (resident)
        ],
        out_specs=pl.BlockSpec((TB, LANES), lambda i: (i, 0)),
        compiler_params=pltpu.CompilerParams(
            dimension_semantics=("parallel",)),
    )(cls, w_p, b_p)

    return out[:B, :C]


# ----------------------------------------------------------------------------
# Deterministic synthetic "encoder" (glue, plain JAX).
# TODO(synk): pretrained BertModel/RobertaModel has no in-script equivalent;
# replaced by a deterministic embedding + mask-aware mixing stub.
# ----------------------------------------------------------------------------
def synthetic_encoder(input_ids, input_mask, segment_ids, tok_emb, seg_emb, pos_emb):
    h = tok_emb[input_ids] + seg_emb[segment_ids] + pos_emb[None, :, :]  # [B,S,H]
    h = h * input_mask[..., None].astype(h.dtype)
    h = jnp.tanh(h)
    return h.astype(jnp.float32)


if __name__ == "__main__":
    B, S, H, C = 4, 16, HIDDEN_STATE_DIM, NUM_CLASSES
    VOCAB, NSEG = 128, 2

    key = jax.random.PRNGKey(0)
    k_ids, k_tok, k_seg, k_pos, k_w, k_b = jax.random.split(key, 6)

    # Inputs (what the PyTorch forward takes).
    input_ids = jax.random.randint(k_ids, (B, S), 0, VOCAB, dtype=jnp.int32)
    input_mask = jnp.ones((B, S), dtype=jnp.int32)
    segment_ids = jnp.zeros((B, S), dtype=jnp.int32)

    # Deterministic synthetic encoder parameters.
    tok_emb = jax.random.normal(k_tok, (VOCAB, H), dtype=jnp.float32) * 0.02
    seg_emb = jax.random.normal(k_seg, (NSEG, H), dtype=jnp.float32) * 0.02
    pos_emb = jax.random.normal(k_pos, (S, H), dtype=jnp.float32) * 0.02

    # Classifier head parameters (nn.Linear(768, 2)).
    weight = jax.random.normal(k_w, (H, C), dtype=jnp.float32) * 0.02
    bias = jax.random.normal(k_b, (C,), dtype=jnp.float32) * 0.02

    # Forward pass.
    all_hidden_states = synthetic_encoder(
        input_ids, input_mask, segment_ids, tok_emb, seg_emb, pos_emb)
    log_probs = fact_verification_head(all_hidden_states, weight, bias)
    log_probs = jax.block_until_ready(log_probs)

    # Reference check in plain JAX (f32 reference; kernel uses bf16 MXU inputs,
    # so allow a small tolerance).
    cls_f32 = all_hidden_states[:, 0]
    ref = jax.nn.log_softmax(cls_f32 @ weight + bias, axis=1)
    assert log_probs.shape == (B, C)
    assert jnp.all(jnp.isfinite(log_probs))
    assert jnp.allclose(log_probs, ref, atol=1e-2, rtol=1e-2)

    print("KERNEL_OK")
</pallas_src>

<mosaic_0001>
module attributes {stable_mosaic.version = 11 : i64} {
  func.func @clf_head_kernel(%arg0: i32, %arg1: memref<8x768xbf16, #tpu.memory_space<vmem>>, %arg2: memref<768x128xbf16, #tpu.memory_space<vmem>>, %arg3: memref<1x128xf32, #tpu.memory_space<vmem>>, %arg4: memref<8x128xf32, #tpu.memory_space<vmem>>) attributes {dimension_semantics = [#tpu.dimension_semantics<parallel>], iteration_bounds = array<i64: 1>, scalar_prefetch = 0 : i64, scratch_operands = 0 : i64, tpu.core_type = #tpu.core_type<tc>, window_params = [{transform_indices = @transform_0, window_bounds = array<i64: 8, 768>}, {pipeline_mode = #tpu.pipeline_mode<synchronous>, transform_indices = @transform_1, window_bounds = array<i64: 768, 128>}, {pipeline_mode = #tpu.pipeline_mode<synchronous>, transform_indices = @transform_2, window_bounds = array<i64: 1, 128>}, {transform_indices = @transform_3, window_bounds = array<i64: 8, 128>}]} {
    %c0 = arith.constant 0 : index
    %c0_0 = arith.constant 0 : index
    %0 = vector.load %arg1[%c0, %c0_0] : memref<8x768xbf16, #tpu.memory_space<vmem>>, vector<8x768xbf16>
    %c0_1 = arith.constant 0 : index
    %c0_2 = arith.constant 0 : index
    %1 = vector.load %arg2[%c0_1, %c0_2] : memref<768x128xbf16, #tpu.memory_space<vmem>>, vector<768x128xbf16>
    %cst = arith.constant dense<0.000000e+00> : vector<8x128xf32>
    %2 = tpu.matmul %0, %1, %cst {dimension_numbers = #tpu.dot_dimension_numbers<[1], [0], [0], [1], [0, 0, 1, 1], [], []>} : vector<8x768xbf16>, vector<768x128xbf16>, vector<8x128xf32> -> vector<8x128xf32>
    %c0_3 = arith.constant 0 : index
    %c0_4 = arith.constant 0 : index
    %3 = vector.load %arg3[%c0_3, %c0_4] : memref<1x128xf32, #tpu.memory_space<vmem>>, vector<1x128xf32>
    %4 = vector.broadcast %3 : vector<1x128xf32> to vector<8x128xf32>
    %5 = arith.addf %2, %4 : vector<8x128xf32>
    %cst_5 = arith.constant dense<0xFF800000> : vector<8xf32>
    %6 = vector.multi_reduction <maximumf>, %5, %cst_5 [1] : vector<8x128xf32> to vector<8xf32>
    %7 = vector.shape_cast %6 : vector<8xf32> to vector<8x1xf32>
    %8 = vector.broadcast %7 : vector<8x1xf32> to vector<8x128xf32>
    %9 = arith.subf %5, %8 : vector<8x128xf32>
    %10 = math.exp %9 : vector<8x128xf32>
    %cst_6 = arith.constant dense<0.000000e+00> : vector<8xf32>
    %11 = vector.multi_reduction <add>, %10, %cst_6 [1] : vector<8x128xf32> to vector<8xf32>
    %12 = vector.shape_cast %11 : vector<8xf32> to vector<8x1xf32>
    %13 = math.log %12 : vector<8x1xf32>
    %14 = vector.broadcast %13 : vector<8x1xf32> to vector<8x128xf32>
    %15 = arith.subf %9, %14 : vector<8x128xf32>
    %c0_7 = arith.constant 0 : index
    %c0_8 = arith.constant 0 : index
    %16 = vector.load %arg4[%c0_7, %c0_8] : memref<8x128xf32, #tpu.memory_space<vmem>>, vector<8x128xf32>
    tpu.vector_store %arg4[%c0_7, %c0_8], %15 {strides = array<i32>} : memref<8x128xf32, #tpu.memory_space<vmem>>, vector<8x128xf32>,
    return
  }
  func.func @transform_0(%arg0: i32) -> (i32, i32) {
    %c0_i32 = arith.constant 0 : i32
    %c0_i32_0 = arith.constant 0 : i32
    return %arg0, %c0_i32 : i32, i32
  }
  func.func @transform_1(%arg0: i32) -> (i32, i32) {
    %c0_i32 = arith.constant 0 : i32
    %c0_i32_0 = arith.constant 0 : i32
    %c0_i32_1 = arith.constant 0 : i32
    return %c0_i32, %c0_i32_0 : i32, i32
  }
  func.func @transform_2(%arg0: i32) -> (i32, i32) {
    %c0_i32 = arith.constant 0 : i32
    %c0_i32_0 = arith.constant 0 : i32
    %c0_i32_1 = arith.constant 0 : i32
    return %c0_i32, %c0_i32_0 : i32, i32
  }
  func.func @transform_3(%arg0: i32) -> (i32, i32) {
    %c0_i32 = arith.constant 0 : i32
    %c0_i32_0 = arith.constant 0 : i32
    return %arg0, %c0_i32 : i32, i32
  }
}

</mosaic_0001>

<bundles_post_ra>
// kernel: tpu_custom_call.1
= control target key start
LH: loop header
LB: loop body
LE: loop exit
PB: predicated region body
PF: predicated region fallthrough
CT: control target
= control target key end

     0   :  { %8 = vsyncpa [#allocation3], 0  ;;  %s891_s0 = inlined_call_operand.hbm [shape: bf16[8,768], index: 0, kind: input, shape index: {}]   ;;  %s892_s1 = inlined_call_operand.hbm [shape: bf16[768,128], index: 1, kind: input, shape index: {}]   ;;  %s893_s2 = inlined_call_operand.vmem [shape: f32[1,128], index: 2, kind: input, shape index: {}]   ;;  %s894_s3 = inlined_call_operand.hbm [shape: f32[8,128], index: 3, kind: output, shape index: {}]  }
   0x1   :  { %9 = vsyncpa [#allocation6], 0 }
   0x2   :  { %10 = vsyncpa [#allocation4], 0  ;;  %s854_s12 = smov [#allocation2]   ;;  %s855_s14 = smov [#allocation5]  }
   0x3   :  { %s17_s13 = sshll.u32 %s854_s12, 4  ;;  %s26_s15 = sshll.u32 %s855_s14, 4  ;;  %s18_s13 = int_to_ptr.vmem [resolvable:$true] %s17_s13  ;;  %s27_s15 = int_to_ptr.vmem [resolvable:$true] %s26_s15 }
   0x4   :  { %s796_s16 = scalar_lea.vmem %s18_s13, 384  ;;  %p801_p1 = scmp.lt.s32.totalorder %s18_s13, %s18_s13 }
   0x5   :  { %p797_p0 = scmp.ne.s32.totalorder %s18_s13, %s796_s16  ;;  %p802_p2 = scmp.lt.s32.totalorder %s796_s16, %s796_s16 }
   0x7   :  { %p803_p3 = por %p802_p2, %p801_p1 }
   0x9   :  { %p804_p4 = pnand %p803_p3, %p797_p0 }
   0xb   :  { %807 = shalt.err (!%p804_p4)
}
   0xc   :  { %20 = dma.hbm_to_vmem [thread:$0]  %s891_s0, 384, %s18_s13, [#allocation3]  }
   0xd   :  { %s816_s19 = scalar_lea.vmem %s27_s15, 6144  ;;  %p821_p6 = scmp.lt.s32.totalorder %s27_s15, %s27_s15 }
   0xe   :  { %p817_p5 = scmp.ne.s32.totalorder %s27_s15, %s816_s19  ;;  %p822_p7 = scmp.lt.s32.totalorder %s816_s19, %s816_s19 }
  0x10   :  { %p823_p8 = por %p822_p7, %p821_p6 }
  0x12   :  { %p824_p9 = pnand %p823_p8, %p817_p5 }
  0x14   :  { %827 = shalt.err (!%p824_p9)
}
  0x15   :  { %s856_s20 = smov 64   ;;  %s857_s21 = smov 4  }
  0x16   :  { %32 = dma.hbm_to_vmem [thread:$0]  %s892_s1, 6144, %s27_s15, [#allocation6], %s856_s20, %s856_s20, %s857_s21  }
  0x17   :  { %848 = dma.done.wait [#allocation3], 384  }
  0x18   :  { %849 = vsyncadd [#allocation3], 4294966912 }
  0x19   :  { %850 = dma.done.wait [#allocation6], 6144  }
  0x1a   :  { %851 = vsyncadd [#allocation6], 4294961152  ;;  %v730_v0 = vld [vmem:[#allocation5 + $0x78] sm:$0xff]   ;;  %v734_v4 = vld [vmem:[#allocation5 + $0x70] sm:$0xff]  }
  0x1b   :  { %v731_v1 = vld [vmem:[#allocation5 + $0x38] sm:$0xff]   ;;  %659 = vmatprep.subr.bf16.mxu0 %v730_v0  ;;  %v735_v5 = vld [vmem:[#allocation5 + $0x30] sm:$0xff]   ;;  %v738_v8 = vld [vmem:[#allocation5 + $0x68] sm:$0xff]  }
  0x1c   :  { %v732_v2 = vld [vmem:[#allocation5 + $0xf8] sm:$0xff]   ;;  %660 = vmatpush3.bf16.msra.mxu0 %v731_v1  ;;  %v736_v6 = vld [vmem:[#allocation5 + $0xf0] sm:$0xff]   ;;  %v739_v9 = vld [vmem:[#allocation5 + $0x28] sm:$0xff]  }
  0x1d   :  { %v733_v3 = vld [vmem:[#allocation5 + $0xb8] sm:$0xff]   ;;  %681 = vmatprep.subr.bf16.mxu1 %v732_v2  ;;  %661 = vmatprep.subr.bf16.mxu0 %v734_v4  ;;  %v737_v7 = vld [vmem:[#allocation5 + $0xb0] sm:$0xff]   ;;  %v740_v10 = vld [vmem:[#allocation5 + $0xe8] sm:$0xff]  }
  0x1e   :  { %682 = vmatpush3.bf16.msra.mxu1 %v733_v3  ;;  %v741_v11 = vld [vmem:[#allocation5 + $0xa8] sm:$0xff]   ;;  %v742_v12 = vld [vmem:[#allocation5 + $0x60] sm:$0xff]   ;;  %v746_v16 = vld [vmem:[#allocation5 + $0x58] sm:$0xff]  }
  0x1f   :  { %683 = vmatprep.subr.bf16.mxu1 %v736_v6  ;;  %v743_v13 = vld [vmem:[#allocation5 + $0x20] sm:$0xff]   ;;  %v747_v17 = vld [vmem:[#allocation5 + $0x18] sm:$0xff]   ;;  %v750_v20 = vld [vmem:[#allocation5 + $0x50] sm:$0xff]  }
  0x20   :  { %662 = vmatpush3.bf16.msra.mxu0 %v735_v5  ;;  %v744_v14 = vld [vmem:[#allocation5 + $0xe0] sm:$0xff]   ;;  %v748_v18 = vld [vmem:[#allocation5 + $0xd8] sm:$0xff]   ;;  %v751_v21 = vld [vmem:[#allocation5 + $0x10] sm:$0xff]  }
  0x21   :  { %663 = vmatprep.subr.bf16.mxu0 %v738_v8  ;;  %v745_v15 = vld [vmem:[#allocation5 + $0xa0] sm:$0xff]   ;;  %v749_v19 = vld [vmem:[#allocation5 + $0x98] sm:$0xff]   ;;  %v752_v22 = vld [vmem:[#allocation5 + $0xd0] sm:$0xff]  }
  0x22   :  { %684 = vmatpush3.bf16.msra.mxu1 %v737_v7  ;;  %v753_v23 = vld [vmem:[#allocation5 + $0x90] sm:$0xff]   ;;  %v754_v24 = vld [vmem:[#allocation5 + $0x48] sm:$0xff]   ;;  %v758_v28 = vld [vmem:[#allocation5 + $0x40] sm:$0xff]  }
  0x23   :  { %685 = vmatprep.subr.bf16.mxu1 %v740_v10  ;;  %v755_v25 = vld [vmem:[#allocation5 + $0x8] sm:$0xff]   ;;  %v759_v29 = vld [vmem:[#allocation5] sm:$0xff]   ;;  %v764_v35 = vld [vmem:[#allocation5 + $0x178] sm:$0xff]  }
  0x24   :  { %664 = vmatpush3.bf16.msra.mxu0 %v739_v9  ;;  %v756_v26 = vld [vmem:[#allocation5 + $0xc8] sm:$0xff]   ;;  %v760_v30 = vld [vmem:[#allocation5 + $0xc0] sm:$0xff]   ;;  %v43_v36 = vld [vmem:[#allocation2 + $0x8] sm:$0xff] }
  0x25   :  { %665 = vmatprep.subr.bf16.mxu0 %v742_v12  ;;  %v757_v27 = vld [vmem:[#allocation5 + $0x88] sm:$0xff]   ;;  %v763_v34 = vld [vmem:[#allocation5 + $0x80] sm:$0xff]   ;;  %v607_v37 = vcombine.low %v43_v36, %v43_v36  ;;  %v608_v38 = vcombine.high %v43_v36, %v43_v36  ;;  %v767_v39 = vld [vmem:[#allocation5 + $0x138] sm:$0xff]  }
  0x26   :  { %686 = vmatpush3.bf16.msra.mxu1 %v741_v11  ;;  %v42_v31 = vld [vmem:[#allocation2] sm:$0xff]  ;;  %v768_v40 = vld [vmem:[#allocation5 + $0x170] sm:$0xff]   ;;  %v772_v44 = vld [vmem:[#allocation5 + $0x160] sm:$0xff]  }
  0x27   :  { %687 = vmatprep.subr.bf16.mxu1 %v744_v14  ;;  %v605_v32 = vcombine.low %v42_v31, %v42_v31  ;;  %v606_v33 = vcombine.high %v42_v31, %v42_v31  ;;  %529 = vmatprep.mubr.bf16.mxu1 %v608_v38  ;;  %v769_v41 = vld [vmem:[#allocation5 + $0x130] sm:$0xff]   ;;  %v770_v42 = vld [vmem:[#allocation5 + $0x168] sm:$0xff]   ;;  %v773_v45 = vld [vmem:[#allocation5 + $0x120] sm:$0xff]  }
  0x28   :  { %666 = vmatpush3.bf16.msra.mxu0 %v743_v13  ;;  %v771_v43 = vld [vmem:[#allocation5 + $0x128] sm:$0xff]   ;;  %v774_v46 = vld [vmem:[#allocation5 + $0x158] sm:$0xff]   ;;  %v776_v49 = vld [vmem:[#allocation5 + $0x150] sm:$0xff]  }
  0x29   :  { %667 = vmatprep.subr.bf16.mxu0 %v746_v16  ;;  %489 = vmatprep.mubr.bf16.mxu0 %v606_v33  ;;  %v775_v47 = vld [vmem:[#allocation5 + $0x118] sm:$0xff]   ;;  %v777_v51 = vld [vmem:[#allocation5 + $0x110] sm:$0xff]   ;;  %v778_v52 = vld [vmem:[#allocation5 + $0x148] sm:$0xff]  }
  0x2a   :  { %688 = vmatpush3.bf16.msra.mxu1 %v745_v15  ;;  %v44_v48 = vld [vmem:[#allocation2 + $0x10] sm:$0xff]  ;;  %v779_v53 = vld [vmem:[#allocation5 + $0x108] sm:$0xff]   ;;  %v780_v54 = vld [vmem:[#allocation5 + $0x140] sm:$0xff]  }
  0x2b   :  { %689 = vmatprep.subr.bf16.mxu1 %v748_v18  ;;  %v610_v50 = vcombine.high %v44_v48, %v44_v48  ;;  %v781_v55 = vld [vmem:[#allocation5 + $0x100] sm:$0xff]   ;;  %v609_v56 = vcombine.low %v44_v48, %v44_v48  ;;  %v604_v2 = vld [vmem:[%s893_s2] ss:$0 sm:$0xff]  ;;  %s858_s2 = smov [#allocation7]  }
  0x2c   :  { %668 = vmatpush3.bf16.msra.mxu0 %v747_v17  ;;  %s594_s24 = sshll.u32 %s858_s2, 4  ;;  %s595_s24 = int_to_ptr.vmem [resolvable:$true] %s594_s24 }
  0x2d   :  { %669 = vmatprep.subr.bf16.mxu0 %v750_v20  ;;  %s828_s25 = scalar_lea.vmem %s595_s24, 128  ;;  %p833_p11 = scmp.lt.s32.totalorder %s595_s24, %s595_s24 }
  0x2e   :  { %690 = vmatpush3.bf16.msra.mxu1 %v749_v19  ;;  %p829_p10 = scmp.ne.s32.totalorder %s595_s24, %s828_s25  ;;  %p834_p12 = scmp.lt.s32.totalorder %s828_s25, %s828_s25 }
  0x2f   :  { %691 = vmatprep.subr.bf16.mxu1 %v752_v22 }
  0x30   :  { %670 = vmatpush3.bf16.msra.mxu0 %v751_v21  ;;  %p835_p13 = por %p834_p12, %p833_p11 }
  0x31   :  { %671 = vmatprep.subr.bf16.mxu0 %v754_v24 }
  0x32   :  { %692 = vmatpush3.bf16.msra.mxu1 %v753_v23  ;;  %p836_p0 = pnand %p835_p13, %p829_p10 }
  0x33   :  { %693 = vmatprep.subr.bf16.mxu1 %v756_v26 }
  0x34   :  { %672 = vmatpush3.bf16.msra.mxu0 %v755_v25 }
  0x35   :  { %673 = vmatprep.subr.bf16.mxu0 %v758_v28 }
  0x36   :  { %694 = vmatpush3.bf16.msra.mxu1 %v757_v27 }
  0x37   :  { %695 = vmatprep.subr.bf16.mxu1 %v760_v30 }
  0x38   :  { %674 = vmatpush3.bf16.msra.mxu0 %v759_v29 }
  0x39   :  { %703 = vmatprep.subr.bf16.mxu0 %v764_v35 }
  0x3a   :  { %696 = vmatpush3.bf16.msra.mxu1 %v763_v34 }
  0x3b   :  { %490 = vmatmul.mubr.bf16.vlgmr.msra.gmra.mxu0 %v605_v32 }
  0x3c   :  { %704 = vmatpush3.bf16.msra.mxu0 %v767_v39  ;;  %569 = vmatprep.mubr.bf16.mxu0 %v610_v50 }
  0x3d   :  { %530 = vmatmul.mubr.bf16.vlgmr.msra.gmra.mxu1 %v607_v37  ;;  %705 = vmatprep.subr.bf16.mxu0 %v768_v40 }
  0x40   :  { %706 = vmatpush3.bf16.msra.mxu0 %v769_v41 }
  0x41   :  { %707 = vmatprep.subr.bf16.mxu0 %v770_v42 }
  0x44   :  { %708 = vmatpush3.bf16.msra.mxu0 %v771_v43 }
  0x45   :  { %709 = vmatprep.subr.bf16.mxu0 %v772_v44 }
  0x48   :  { %710 = vmatpush3.bf16.msra.mxu0 %v773_v45 }
  0x49   :  { %711 = vmatprep.subr.bf16.mxu0 %v774_v46 }
  0x4c   :  { %712 = vmatpush3.bf16.msra.mxu0 %v775_v47 }
  0x4d   :  { %713 = vmatprep.subr.bf16.mxu0 %v776_v49 }
  0x50   :  { %714 = vmatpush3.bf16.msra.mxu0 %v777_v51 }
  0x51   :  { %715 = vmatprep.subr.bf16.mxu0 %v778_v52 }
  0x54   :  { %716 = vmatpush3.bf16.msra.mxu0 %v779_v53 }
  0x55   :  { %717 = vmatprep.subr.bf16.mxu0 %v780_v54 }
  0x58   :  { %718 = vmatpush3.bf16.msra.mxu0 %v781_v55 }
  0x5b   :  { %570 = vmatmul.mubr.bf16.vlgmr.msra.gmra.mxu0 %v609_v56 }
  0xfb   :  { %v675_v57 = vpop.f32.mrf.mxu0 }
  0xfd   :  { %v676_v58 = vpop.f32.mrf.mxu0  ;;  %v697_v59 = vpop.f32.mrf.mxu1 }
  0xfe   :  { %v677_v1 = vadd.f32 %v676_v58, %v675_v57 }
  0xff   :  { %v678_v60 = vpop.f32.mrf.mxu0  ;;  %v698_v61 = vpop.f32.mrf.mxu1 }
 0x100   :  { %v492_v3 = vadd.f32 %v677_v1, %v604_v2  ;;  %v699_v4 = vadd.f32 %v698_v61, %v697_v59 }
 0x101   :  { %v679_v62 = vpop.f32.mrf.mxu0  ;;  %v700_v63 = vpop.f32.mrf.mxu1 }
 0x102   :  { %v532_v7 = vadd.f32 %v699_v4, %v492_v3 }
 0x103   :  { %v701_v0 = vpop.f32.mrf.mxu1 }
 0x11b   :  { %v719_v5 = vpop.f32.mrf.mxu0 }
 0x11d   :  { %v720_v6 = vpop.f32.mrf.mxu0 }
 0x11e   :  { %v721_v8 = vadd.f32 %v720_v6, %v719_v5 }
 0x11f   :  { %v722_v9 = vpop.f32.mrf.mxu0 }
 0x120   :  { %v572_v10 = vadd.f32 %v721_v8, %v532_v7 }
 0x121   :  { %v723_v11 = vpop.f32.mrf.mxu0 }
 0x122   :  { %577 = vmax.xlane.f32.xlu0 %v572_v10 }
 0x1ab   :  { %v578_v12 = vpop.xlane.xlu0 %577 }
 0x1ac   :  { %v579_v13 = vsub.f32 %v572_v10, %v578_v12 }
 0x1ae   :  { %v580_v14 = vmul.f32 1.442695, %v579_v13 }
 0x1b0   :  { %784 = vpow2.f32 %v580_v14 }
 0x1bd   :  { %v785_v15 = vpop.eup %784 }
 0x1be   :  { %582 = vadd.xlane.f32.xlu0 %v785_v15 }
 0x247   :  { %v583_v16 = vpop.xlane.xlu0 %582 }
 0x248   :  { %786 = vlog2.f32 %v583_v16 }
 0x255   :  { %v787_v17 = vpop.eup %786 }
 0x256   :  { %v585_v18 = vmul.f32 0.6931472, %v787_v17 }
 0x258   :  { %v586_v19 = vsub.f32 %v579_v13, %v585_v18 }
 0x25a   :  { %587 = vst [vmem:[#allocation7] sm:$0xff] %v586_v19 }
 0x25b   :  { %839 = shalt.err (!%p836_p0)
}
 0x25c   :  { %597 = dma.vmem_to_hbm [thread:$0]  %s595_s24, 128, %s894_s3, [#allocation4]  }
 0x25d   :  { %852 = dma.done.wait [#allocation4], 128  }
 0x25e   :  { %853 = vsyncadd [#allocation4], 4294967168 }
 0x25f   :  { %601 = vsyncpa [#allocation3], 1 }
 0x260   :  { %602 = vsyncpa [#allocation6], 1 }
 0x261   :  { %603 = vsyncpa [#allocation4], 1 }

</bundles_post_ra>
